<compile_context>
chip_gen: v7x
topology: tpu7x:2x2x1
jax: 0.10.0
libtpu: 0.0.40
codegen_flags: <defaults>
</compile_context>

<pallas_src>
import math
import functools

import jax
import jax.numpy as jnp
from jax.experimental import pallas as pl
from jax.experimental.pallas import tpu as pltpu


# ----------------------------------------------------------------------------
# Kernels
# ----------------------------------------------------------------------------
def _layer_norm(x, gamma, beta, eps=1e-5):
    # x: (T, D) f32; gamma/beta: (1, D) f32.  Stats kept in f32 (v5e has no
    # bf16 VPU/EUP and the torch LayerNorm subclass upcasts to f32 anyway).
    mu = jnp.mean(x, axis=-1, keepdims=True)
    var = jnp.mean((x - mu) ** 2, axis=-1, keepdims=True)
    return (x - mu) * jax.lax.rsqrt(var + eps) * gamma + beta


def _ln_qkv_kernel(x_ref, g1_ref, b1_ref, wqkv_ref, bqkv_ref,
                   q_ref, k_ref, v_ref, *, d_model, scale):
    # x_ref: (TS, D) f32; wqkv_ref: (D, 3D) bf16; q/k/v_ref: (TS, D) bf16.
    x = x_ref[...].astype(jnp.float32)
    h = _layer_norm(x, g1_ref[...], b1_ref[...])
    qkv = jnp.dot(h.astype(wqkv_ref.dtype), wqkv_ref[...],
                  preferred_element_type=jnp.float32)
    qkv = qkv + bqkv_ref[...].astype(jnp.float32)
    D = d_model
    # Fold 1/sqrt(dh) into Q here (TS*D mults) instead of scaling the (TQ,TK)
    # score matrices (S^2 mults) inside the attention kernel.
    q_ref[...] = (qkv[:, :D] * scale).astype(q_ref.dtype)
    k_ref[...] = qkv[:, D:2 * D].astype(k_ref.dtype)
    v_ref[...] = qkv[:, 2 * D:].astype(v_ref.dtype)


def _flash_attn_kernel(q_ref, k_ref, v_ref, o_ref, m_sc, l_sc, acc_sc,
                       *, n_heads):
    # q_ref: (TQ, D) bf16 (pre-scaled); k_ref/v_ref: (TK, D) bf16;
    # o_ref: (TQ, D); scratch: m_sc/l_sc (TQ, H) f32, acc_sc (TQ, D) f32.
    kv = pl.program_id(2)

    @pl.when(kv == 0)
    def _():
        m_sc[...] = jnp.full_like(m_sc, -jnp.inf)
        l_sc[...] = jnp.zeros_like(l_sc)
        acc_sc[...] = jnp.zeros_like(acc_sc)

    D = q_ref.shape[-1]
    dh = D // n_heads
    q = q_ref[...]
    k = k_ref[...]
    v = v_ref[...]

    # All heads handled per grid step (lane-dense output, amortized DMA).
    for h in range(n_heads):
        cs = slice(h * dh, (h + 1) * dh)
        # scores[i, j] = sum_d q[i, d] * k[j, d]  (bf16 operands, f32 acc)
        s = jax.lax.dot_general(q[:, cs], k[:, cs],
                                (((1,), (1,)), ((), ())),
                                preferred_element_type=jnp.float32)
        m_prev = m_sc[:, h:h + 1]
        l_prev = l_sc[:, h:h + 1]
        m_new = jnp.maximum(m_prev, jnp.max(s, axis=-1, keepdims=True))
        alpha = jnp.exp(m_prev - m_new)
        p = jnp.exp(s - m_new)
        l_sc[:, h:h + 1] = alpha * l_prev + jnp.sum(p, axis=-1, keepdims=True)
        m_sc[:, h:h + 1] = m_new
        acc_sc[:, cs] = alpha * acc_sc[:, cs] + jnp.dot(
            p.astype(v.dtype), v[:, cs], preferred_element_type=jnp.float32)

    @pl.when(kv == pl.num_programs(2) - 1)
    def _():
        pieces = []
        for h in range(n_heads):
            inv_l = pl.reciprocal(l_sc[:, h:h + 1], approx=True)
            pieces.append(acc_sc[:, h * dh:(h + 1) * dh] * inv_l)
        o_ref[...] = jnp.concatenate(pieces, axis=-1).astype(o_ref.dtype)


def _proj_ffn_kernel(ctx_ref, wo_ref, bo_ref, g2_ref, b2_ref,
                     w1_ref, bb1_ref, w2_ref, bb2_ref, o_ref):
    # ctx_ref: (TS, D) bf16; weights bf16; biases / LN params f32.
    ctx = ctx_ref[...]
    y1 = jnp.dot(ctx, wo_ref[...],
                 preferred_element_type=jnp.float32) + bo_ref[...]
    # SublayerConnection #1: y1 + dropout(y1)  (eval mode => 2*y1)
    x1 = y1 + y1
    h2 = _layer_norm(x1, g2_ref[...], b2_ref[...])
    hidden = jnp.dot(h2.astype(w1_ref.dtype), w1_ref[...],
                     preferred_element_type=jnp.float32) + bb1_ref[...]
    hidden = jnp.maximum(hidden, 0.0)
    y2 = jnp.dot(hidden.astype(w2_ref.dtype), w2_ref[...],
                 preferred_element_type=jnp.float32) + bb2_ref[...]
    # SublayerConnection #2: y2 + dropout(y2)  (eval mode => 2*y2)
    o_ref[...] = (y2 + y2).astype(o_ref.dtype)


# ----------------------------------------------------------------------------
# Wrapper
# ----------------------------------------------------------------------------
_VMEM_LIMIT = 64 * 1024 * 1024  # safe on v5e/v6e (128 MiB phys) and v7x (64 MiB)


def _pick_seq_tile(seq_len, row_bytes, target_bytes=8 << 20):
    """Largest multiple-of-8 divisor of seq_len whose block stays <= target."""
    if seq_len % 8 != 0:
        return seq_len
    divs = [d for d in range(8, seq_len + 1, 8) if seq_len % d == 0]
    fitting = [d for d in divs if d * row_bytes <= target_bytes]
    return max(fitting) if fitting else min(divs)


def encoder_layer(x, params, *, n_heads, mask=None):
    """x: (B, S, D) float32.  `mask` accepted for API parity but unused,
    matching the reference forward (it never passes mask to self_attn)."""
    del mask
    B, S, D = x.shape
    dh = D // n_heads
    d_ff = params["w1"].shape[1]
    scale = 1.0 / math.sqrt(dh)
    bf16 = jnp.bfloat16

    # Cast matmul weight operands to bf16 once at the wrapper level (biases
    # and LN params stay f32; accumulation stays f32 inside the kernels).
    wqkv = params["wqkv"].astype(bf16)
    wo = params["wo"].astype(bf16)
    w1 = params["w1"].astype(bf16)
    w2 = params["w2"].astype(bf16)

    # Generation-aware-ish tile sizing: ~8 MiB activation slabs per step.
    ts1 = _pick_seq_tile(S, 4 * D + 6 * D + 12 * D)           # x + q/k/v + qkv
    tq = _pick_seq_tile(S, 2 * D + 4 * D + 2 * D, 4 << 20)    # q + acc + out
    tk = _pick_seq_tile(S, 4 * D, 4 << 20)                    # k + v (bf16)
    ts3 = _pick_seq_tile(S, 2 * D + 4 * D + 4 * D + 6 * d_ff)  # ctx/out/hidden

    par2 = pltpu.CompilerParams(
        dimension_semantics=("parallel", "parallel"),
        vmem_limit_bytes=_VMEM_LIMIT)
    par3 = pltpu.CompilerParams(
        dimension_semantics=("parallel", "parallel", "arbitrary"),
        vmem_limit_bytes=_VMEM_LIMIT)
    const2 = lambda b, s: (0, 0)

    # --- 1) LayerNorm1 + QKV projection -> Q (pre-scaled), K, V in bf16 -----
    seq_spec_1 = pl.BlockSpec((None, ts1, D), lambda b, s: (b, s, 0))
    q, k, v = pl.pallas_call(
        functools.partial(_ln_qkv_kernel, d_model=D, scale=scale),
        out_shape=(jax.ShapeDtypeStruct((B, S, D), bf16),
                   jax.ShapeDtypeStruct((B, S, D), bf16),
                   jax.ShapeDtypeStruct((B, S, D), bf16)),
        grid=(B, S // ts1),
        in_specs=[
            seq_spec_1,                                        # x
            pl.BlockSpec((1, D), const2),                      # gamma1
            pl.BlockSpec((1, D), const2),                      # beta1
            pl.BlockSpec((D, 3 * D), const2),                  # Wqkv (resident)
            pl.BlockSpec((1, 3 * D), const2),                  # bqkv
        ],
        out_specs=[seq_spec_1, seq_spec_1, seq_spec_1],
        compiler_params=par2,
    )(x, params["g1"], params["b1"], wqkv, params["bqkv"])

    # --- 2) flash-style attention, all heads per step, lane-dense output ----
    ctx = pl.pallas_call(
        functools.partial(_flash_attn_kernel, n_heads=n_heads),
        out_shape=jax.ShapeDtypeStruct((B, S, D), bf16),
        grid=(B, S // tq, S // tk),
        in_specs=[
            pl.BlockSpec((None, tq, D), lambda b, qi, ki: (b, qi, 0)),  # Q
            pl.BlockSpec((None, tk, D), lambda b, qi, ki: (b, ki, 0)),  # K
            pl.BlockSpec((None, tk, D), lambda b, qi, ki: (b, ki, 0)),  # V
        ],
        out_specs=pl.BlockSpec((None, tq, D), lambda b, qi, ki: (b, qi, 0)),
        scratch_shapes=[
            pltpu.VMEM((tq, n_heads), jnp.float32),   # running max (per head)
            pltpu.VMEM((tq, n_heads), jnp.float32),   # running sum (per head)
            pltpu.VMEM((tq, D), jnp.float32),         # un-normalized output
        ],
        compiler_params=par3,
    )(q, k, v)

    # --- 3) out-proj + residual + LayerNorm2 + FFN + residual (fused) -------
    seq_spec_3 = pl.BlockSpec((None, ts3, D), lambda b, s: (b, s, 0))
    out = pl.pallas_call(
        _proj_ffn_kernel,
        out_shape=jax.ShapeDtypeStruct((B, S, D), x.dtype),
        grid=(B, S // ts3),
        in_specs=[
            seq_spec_3,                                        # ctx (bf16)
            pl.BlockSpec((D, D), const2),                      # Wo
            pl.BlockSpec((1, D), const2),                      # bo
            pl.BlockSpec((1, D), const2),                      # gamma2
            pl.BlockSpec((1, D), const2),                      # beta2
            pl.BlockSpec((D, d_ff), const2),                   # W1
            pl.BlockSpec((1, d_ff), const2),                   # b1
            pl.BlockSpec((d_ff, D), const2),                   # W2
            pl.BlockSpec((1, D), const2),                      # b2
        ],
        out_specs=seq_spec_3,
        compiler_params=par2,
    )(ctx, wo, params["bo"], params["g2"], params["b2"],
      w1, params["bb1"], w2, params["bb2"])
    return out


# ----------------------------------------------------------------------------
# Parameter setup + pure-JAX (f32) reference
# ----------------------------------------------------------------------------
def init_encoder_layer_params(key, d_model, d_ff):
    ks = jax.random.split(key, 10)
    n = lambda k, shape, s=0.1: s * jax.random.normal(k, shape, jnp.float32)
    return dict(
        g1=1.0 + n(ks[0], (1, d_model), 0.05),
        b1=n(ks[1], (1, d_model), 0.05),
        wqkv=n(ks[2], (d_model, 3 * d_model)),
        bqkv=n(ks[3], (1, 3 * d_model), 0.05),
        wo=n(ks[4], (d_model, d_model)),
        bo=n(ks[5], (1, d_model), 0.05),
        g2=1.0 + n(ks[6], (1, d_model), 0.05),
        b2=n(ks[7], (1, d_model), 0.05),
        w1=n(ks[8], (d_model, d_ff)),
        bb1=jnp.zeros((1, d_ff), jnp.float32),
        w2=n(ks[9], (d_ff, d_model)),
        bb2=jnp.zeros((1, d_model), jnp.float32),
    )


def encoder_layer_ref(x, p, *, n_heads):
    B, S, D = x.shape
    dh = D // n_heads

    def ln(t, g, b):
        mu = t.mean(-1, keepdims=True)
        var = ((t - mu) ** 2).mean(-1, keepdims=True)
        return (t - mu) / jnp.sqrt(var + 1e-5) * g + b

    h1 = ln(x, p["g1"], p["b1"])
    qkv = h1 @ p["wqkv"] + p["bqkv"]
    q, k, v = jnp.split(qkv, 3, axis=-1)
    heads = lambda t: t.reshape(B, S, n_heads, dh).transpose(0, 2, 1, 3)
    qh, kh, vh = heads(q), heads(k), heads(v)
    s = jnp.einsum("bhqd,bhkd->bhqk", qh, kh) / math.sqrt(dh)
    pa = jax.nn.softmax(s, axis=-1)
    ctx = jnp.einsum("bhqk,bhkd->bhqd", pa, vh).transpose(0, 2, 1, 3).reshape(B, S, D)
    y1 = ctx @ p["wo"] + p["bo"]
    x1 = y1 + y1
    h2 = ln(x1, p["g2"], p["b2"])
    y2 = jnp.maximum(h2 @ p["w1"] + p["bb1"], 0.0) @ p["w2"] + p["bb2"]
    return y2 + y2


# ----------------------------------------------------------------------------
# Demo
# ----------------------------------------------------------------------------
if __name__ == "__main__":
    B, S, D, H, D_FF = 2, 8, 32, 4, 64

    key = jax.random.PRNGKey(0)
    kx, kp = jax.random.split(key)
    x = jax.random.normal(kx, (B, S, D), dtype=jnp.float32)
    params = init_encoder_layer_params(kp, D, D_FF)

    out = encoder_layer(x, params, n_heads=H, mask=None)
    out = jax.block_until_ready(out)

    ref = encoder_layer_ref(x, params, n_heads=H)
    assert out.shape == (B, S, D)
    err = float(jnp.max(jnp.abs(out - ref)))
    # bf16 MXU operands + approx reciprocal => looser tolerance than pure f32.
    assert jnp.allclose(out, ref, atol=5e-2, rtol=5e-2), f"max abs err {err}"

    print("KERNEL_OK")
</pallas_src>

<mosaic_0001>
module attributes {stable_mosaic.version = 11 : i64} {
  func.func @_ln_qkv_kernel(%arg0: i32, %arg1: i32, %arg2: memref<1x8x32xf32, #tpu.memory_space<vmem>>, %arg3: memref<1x32xf32, #tpu.memory_space<vmem>>, %arg4: memref<1x32xf32, #tpu.memory_space<vmem>>, %arg5: memref<32x96xbf16, #tpu.memory_space<vmem>>, %arg6: memref<1x96xf32, #tpu.memory_space<vmem>>, %arg7: memref<1x8x32xbf16, #tpu.memory_space<vmem>>, %arg8: memref<1x8x32xbf16, #tpu.memory_space<vmem>>, %arg9: memref<1x8x32xbf16, #tpu.memory_space<vmem>>) attributes {dimension_semantics = [#tpu.dimension_semantics<parallel>, #tpu.dimension_semantics<parallel>], iteration_bounds = array<i64: 2, 1>, scalar_prefetch = 0 : i64, scratch_operands = 0 : i64, tpu.core_type = #tpu.core_type<tc>, window_params = [{transform_indices = @transform_0, window_bounds = array<i64: 1, 8, 32>}, {pipeline_mode = #tpu.pipeline_mode<synchronous>, transform_indices = @transform_1, window_bounds = array<i64: 1, 32>}, {pipeline_mode = #tpu.pipeline_mode<synchronous>, transform_indices = @transform_2, window_bounds = array<i64: 1, 32>}, {pipeline_mode = #tpu.pipeline_mode<synchronous>, transform_indices = @transform_3, window_bounds = array<i64: 32, 96>}, {pipeline_mode = #tpu.pipeline_mode<synchronous>, transform_indices = @transform_4, window_bounds = array<i64: 1, 96>}, {transform_indices = @transform_5, window_bounds = array<i64: 1, 8, 32>}, {transform_indices = @transform_6, window_bounds = array<i64: 1, 8, 32>}, {transform_indices = @transform_7, window_bounds = array<i64: 1, 8, 32>}]} {
    %c0 = arith.constant 0 : index
    %c0_0 = arith.constant 0 : index
    %c0_1 = arith.constant 0 : index
    %0 = vector.load %arg2[%c0, %c0_0, %c0_1] : memref<1x8x32xf32, #tpu.memory_space<vmem>>, vector<1x8x32xf32>
    %1 = vector.shape_cast %0 : vector<1x8x32xf32> to vector<8x32xf32>
    %c0_2 = arith.constant 0 : index
    %c0_3 = arith.constant 0 : index
    %2 = vector.load %arg3[%c0_2, %c0_3] : memref<1x32xf32, #tpu.memory_space<vmem>>, vector<1x32xf32>
    %c0_4 = arith.constant 0 : index
    %c0_5 = arith.constant 0 : index
    %3 = vector.load %arg4[%c0_4, %c0_5] : memref<1x32xf32, #tpu.memory_space<vmem>>, vector<1x32xf32>
    %cst = arith.constant dense<0.000000e+00> : vector<8xf32>
    %4 = vector.multi_reduction <add>, %1, %cst [1] : vector<8x32xf32> to vector<8xf32>
    %5 = vector.shape_cast %4 : vector<8xf32> to vector<8x1xf32>
    %cst_6 = arith.constant 3.200000e+01 : f32
    %6 = vector.broadcast %cst_6 : f32 to vector<8x1xf32>
    %7 = arith.divf %5, %6 : vector<8x1xf32>
    %8 = vector.broadcast %7 : vector<8x1xf32> to vector<8x32xf32>
    %9 = arith.subf %1, %8 : vector<8x32xf32>
    %10 = arith.mulf %9, %9 : vector<8x32xf32>
    %cst_7 = arith.constant dense<0.000000e+00> : vector<8xf32>
    %11 = vector.multi_reduction <add>, %10, %cst_7 [1] : vector<8x32xf32> to vector<8xf32>
    %12 = vector.shape_cast %11 : vector<8xf32> to vector<8x1xf32>
    %cst_8 = arith.constant 3.200000e+01 : f32
    %13 = vector.broadcast %cst_8 : f32 to vector<8x1xf32>
    %14 = arith.divf %12, %13 : vector<8x1xf32>
    %15 = vector.broadcast %7 : vector<8x1xf32> to vector<8x32xf32>
    %16 = arith.subf %1, %15 : vector<8x32xf32>
    %cst_9 = arith.constant 9.99999974E-6 : f32
    %17 = vector.broadcast %cst_9 : f32 to vector<8x1xf32>
    %18 = arith.addf %14, %17 : vector<8x1xf32>
    %19 = math.rsqrt %18 : vector<8x1xf32>
    %20 = vector.broadcast %19 : vector<8x1xf32> to vector<8x32xf32>
    %21 = arith.mulf %16, %20 : vector<8x32xf32>
    %22 = vector.broadcast %2 : vector<1x32xf32> to vector<8x32xf32>
    %23 = arith.mulf %21, %22 : vector<8x32xf32>
    %24 = vector.broadcast %3 : vector<1x32xf32> to vector<8x32xf32>
    %25 = arith.addf %23, %24 : vector<8x32xf32>
    %26 = arith.truncf %25 : vector<8x32xf32> to vector<8x32xbf16>
    %c0_10 = arith.constant 0 : index
    %c0_11 = arith.constant 0 : index
    %27 = vector.load %arg5[%c0_10, %c0_11] : memref<32x96xbf16, #tpu.memory_space<vmem>>, vector<32x96xbf16>
    %cst_12 = arith.constant dense<0.000000e+00> : vector<8x96xf32>
    %28 = tpu.matmul %26, %27, %cst_12 {dimension_numbers = #tpu.dot_dimension_numbers<[1], [0], [0], [1], [0, 0, 1, 1], [], []>} : vector<8x32xbf16>, vector<32x96xbf16>, vector<8x96xf32> -> vector<8x96xf32>
    %c0_13 = arith.constant 0 : index
    %c0_14 = arith.constant 0 : index
    %29 = vector.load %arg6[%c0_13, %c0_14] : memref<1x96xf32, #tpu.memory_space<vmem>>, vector<1x96xf32>
    %30 = vector.broadcast %29 : vector<1x96xf32> to vector<8x96xf32>
    %31 = arith.addf %28, %30 : vector<8x96xf32>
    %32 = vector.extract_strided_slice %31 {offsets = [0, 0], sizes = [8, 32], strides = [1, 1]} : vector<8x96xf32> to vector<8x32xf32>
    %cst_15 = arith.constant 0.353553385 : f32
    %33 = vector.broadcast %cst_15 : f32 to vector<8x32xf32>
    %34 = arith.mulf %32, %33 : vector<8x32xf32>
    %35 = arith.truncf %34 : vector<8x32xf32> to vector<8x32xbf16>
    %c0_16 = arith.constant 0 : index
    %c0_17 = arith.constant 0 : index
    %c0_18 = arith.constant 0 : index
    %36 = vector.load %arg7[%c0_16, %c0_17, %c0_18] : memref<1x8x32xbf16, #tpu.memory_space<vmem>>, vector<1x8x32xbf16>
    %37 = vector.shape_cast %36 : vector<1x8x32xbf16> to vector<8x32xbf16>
    %38 = vector.shape_cast %35 : vector<8x32xbf16> to vector<1x8x32xbf16>
    tpu.vector_store %arg7[%c0_16, %c0_17, %c0_18], %38 {strides = array<i32>} : memref<1x8x32xbf16, #tpu.memory_space<vmem>>, vector<1x8x32xbf16>,
    %39 = vector.extract_strided_slice %31 {offsets = [0, 32], sizes = [8, 32], strides = [1, 1]} : vector<8x96xf32> to vector<8x32xf32>
    %40 = arith.truncf %39 : vector<8x32xf32> to vector<8x32xbf16>
    %c0_19 = arith.constant 0 : index
    %c0_20 = arith.constant 0 : index
    %c0_21 = arith.constant 0 : index
    %41 = vector.load %arg8[%c0_19, %c0_20, %c0_21] : memref<1x8x32xbf16, #tpu.memory_space<vmem>>, vector<1x8x32xbf16>
    %42 = vector.shape_cast %41 : vector<1x8x32xbf16> to vector<8x32xbf16>
    %43 = vector.shape_cast %40 : vector<8x32xbf16> to vector<1x8x32xbf16>
    tpu.vector_store %arg8[%c0_19, %c0_20, %c0_21], %43 {strides = array<i32>} : memref<1x8x32xbf16, #tpu.memory_space<vmem>>, vector<1x8x32xbf16>,
    %44 = vector.extract_strided_slice %31 {offsets = [0, 64], sizes = [8, 32], strides = [1, 1]} : vector<8x96xf32> to vector<8x32xf32>
    %45 = arith.truncf %44 : vector<8x32xf32> to vector<8x32xbf16>
    %c0_22 = arith.constant 0 : index
    %c0_23 = arith.constant 0 : index
    %c0_24 = arith.constant 0 : index
    %46 = vector.load %arg9[%c0_22, %c0_23, %c0_24] : memref<1x8x32xbf16, #tpu.memory_space<vmem>>, vector<1x8x32xbf16>
    %47 = vector.shape_cast %46 : vector<1x8x32xbf16> to vector<8x32xbf16>
    %48 = vector.shape_cast %45 : vector<8x32xbf16> to vector<1x8x32xbf16>
    tpu.vector_store %arg9[%c0_22, %c0_23, %c0_24], %48 {strides = array<i32>} : memref<1x8x32xbf16, #tpu.memory_space<vmem>>, vector<1x8x32xbf16>,
    return
  }
  func.func @transform_0(%arg0: i32, %arg1: i32) -> (i32, i32, i32) {
    %c0_i32 = arith.constant 0 : i32
    %c0_i32_0 = arith.constant 0 : i32
    return %arg0, %arg1, %c0_i32 : i32, i32, i32
  }
  func.func @transform_1(%arg0: i32, %arg1: i32) -> (i32, i32) {
    %c0_i32 = arith.constant 0 : i32
    %c0_i32_0 = arith.constant 0 : i32
    %c0_i32_1 = arith.constant 0 : i32
    return %c0_i32, %c0_i32_0 : i32, i32
  }
  func.func @transform_2(%arg0: i32, %arg1: i32) -> (i32, i32) {
    %c0_i32 = arith.constant 0 : i32
    %c0_i32_0 = arith.constant 0 : i32
    %c0_i32_1 = arith.constant 0 : i32
    return %c0_i32, %c0_i32_0 : i32, i32
  }
  func.func @transform_3(%arg0: i32, %arg1: i32) -> (i32, i32) {
    %c0_i32 = arith.constant 0 : i32
    %c0_i32_0 = arith.constant 0 : i32
    %c0_i32_1 = arith.constant 0 : i32
    return %c0_i32, %c0_i32_0 : i32, i32
  }
  func.func @transform_4(%arg0: i32, %arg1: i32) -> (i32, i32) {
    %c0_i32 = arith.constant 0 : i32
    %c0_i32_0 = arith.constant 0 : i32
    %c0_i32_1 = arith.constant 0 : i32
    return %c0_i32, %c0_i32_0 : i32, i32
  }
  func.func @transform_5(%arg0: i32, %arg1: i32) -> (i32, i32, i32) {
    %c0_i32 = arith.constant 0 : i32
    %c0_i32_0 = arith.constant 0 : i32
    return %arg0, %arg1, %c0_i32 : i32, i32, i32
  }
  func.func @transform_6(%arg0: i32, %arg1: i32) -> (i32, i32, i32) {
    %c0_i32 = arith.constant 0 : i32
    %c0_i32_0 = arith.constant 0 : i32
    return %arg0, %arg1, %c0_i32 : i32, i32, i32
  }
  func.func @transform_7(%arg0: i32, %arg1: i32) -> (i32, i32, i32) {
    %c0_i32 = arith.constant 0 : i32
    %c0_i32_0 = arith.constant 0 : i32
    return %arg0, %arg1, %c0_i32 : i32, i32, i32
  }
}

</mosaic_0001>

<bundles_post_ra>
// kernel: tpu_custom_call.1
= control target key start
LH: loop header
LB: loop body
LE: loop exit
PB: predicated region body
PF: predicated region fallthrough
CT: control target
= control target key end

     0   :  { %s1625_s0 = inlined_call_operand.hbm [shape: f32[2,8,32], index: 0, kind: input, shape index: {}]   ;;  %s1626_s1 = inlined_call_operand.hbm [shape: f32[1,32], index: 1, kind: input, shape index: {}]   ;;  %s1627_s2 = inlined_call_operand.hbm [shape: f32[1,32], index: 2, kind: input, shape index: {}]   ;;  %s1628_s3 = inlined_call_operand.hbm [shape: bf16[32,96], index: 3, kind: input, shape index: {}]   ;;  %s1629_s4 = inlined_call_operand.hbm [shape: f32[1,96], index: 4, kind: input, shape index: {}]   ;;  %s1630_s5 = inlined_call_operand.hbm [shape: bf16[2,8,32], index: 5, kind: output, shape index: {0}]   ;;  %s1631_s6 = inlined_call_operand.hbm [shape: bf16[2,8,32], index: 6, kind: output, shape index: {1}]   ;;  %s1632_s7 = inlined_call_operand.hbm [shape: bf16[2,8,32], index: 7, kind: output, shape index: {2}]  }
   0x1   :  { %1637 = sst [smem:[#allocation20_spill]] %s1626_s1 }
   0x2   :  { %1638 = sst [smem:[#allocation21_spill]] %s1627_s2 }
   0x3   :  { %13 = vsyncpa [#allocation3], 0 }
   0x4   :  { %15 = vsyncpa [#allocation3 + $0x1], 0 }
   0x5   :  { %16 = vsyncpa [#allocation6], 0 }
   0x6   :  { %17 = vsyncpa [#allocation9], 0 }
   0x7   :  { %18 = vsyncpa [#allocation4], 0 }
   0x8   :  { %20 = vsyncpa [#allocation4 + $0x1], 0 }
   0x9   :  { %21 = vsyncpa [#allocation13], 0 }
   0xa   :  { %23 = vsyncpa [#allocation13 + $0x1], 0  ;;  %s1252_s24 = smov 0   ;;  %s1254_s25 = smov 0  }
   0xb   :  { %s1256_s26 = smov 0   ;;  %s1258_s27 = smov 0  }
   0xc   :  { %s1260_s28 = smov 0   ;;  %s1262_s29 = smov 0  }
   0xd LB: > { %s1283_s30 = sadd.s32 4294967295, %s1196_s29   ;;  %p737_p0 = scmp.ge.s32.totalorder %s1196_s29, 1  ;;  %s1196_s29 = sphi %s1262_s29, %s29_s29   ;;  %s1192_s28 = sphi %s1260_s28, %s1663_s28   ;;  %s1188_s27 = sphi %s1258_s27, %s1662_s27   ;;  %s1184_s26 = sphi %s1256_s26, %s1661_s26   ;;  %s1180_s25 = sphi %s1254_s25, %s1660_s25   ;;  %s1176_s24 = sphi %s1252_s24, %s1659_s24  }
   0xe   : > { %p1633_p1 = scmp.eq.s32.totalorder %s1283_s30, 0  ;;  %p242_p2 = scmp.lt.s32.totalorder %s1196_s29, 3 }
   0xf   : > { %s1198_s9 = smov [#allocation5]   ;;  %s1199_s11 = smov [#allocation8]  }
  0x10   : > { %p1288_p3 = pnand %p737_p0, %p242_p2  ;;  %s255_s10 = sshll.u32 %s1198_s9, 4  ;;  %s256_s10 = int_to_ptr.vmem [resolvable:$true] %s255_s10 }
  0x11   : > { %s276_s12 = sshll.u32 %s1199_s11, 4  ;;  %s1200_s14 = smov [#allocation7]   ;;  %s1301_s12 = int_to_ptr.vmem [resolvable:$true] %s276_s12 }
  0x12   : > { %s1639_s8 = scalar_select %p1288_p3, 1, 0 }
  0x13   : > { %p805_p5 = pneg %p1288_p3  ;;  %s1303_s15 = sshll.u32 %s1200_s14, 4  ;;  %s267_s15 = int_to_ptr.vmem [resolvable:$true] %s1303_s15 }
  0x14   : > { %s1641_s1 = sld [smem:[#allocation20_spill]] }
  0x15   : > { %p1297_p6 = pnand %p805_p5, %p1633_p1 }
  0x17   : > { %p1313_p8 = pneg %p1297_p6 }
  0x1a   : > { %s904_s18 = scalar_lea.hbm %s1641_s1, 16 }
  0x1b   : > { %p905_p7 = scmp.ne.s32.totalorder %s1641_s1, %s904_s18  ;;  %p911_p11 = scmp.lt.u32.totalorder %s904_s18, %s1641_s1 }
  0x1d   : > { %p907_p9 = pnand %p1313_p8, %p905_p7 }
  0x1f   : > { %p908_p10 = pneg %p907_p9 }
  0x21   : > { %p913_p12 = pnand %p911_p11, %p908_p10 }
  0x23   : > { %916 = shalt.err (!%p913_p12)
}
  0x24   : > { %s917_s9 = scalar_lea.vmem %s256_s10, 16  ;;  %s924_s11 = scalar_lea.vmem %s256_s10, 32 }
  0x25   : > { %p918_p13 = scmp.ne.s32.totalorder %s256_s10, %s917_s9  ;;  %p925_p5 = scmp.lt.s32.totalorder %s256_s10, %s256_s10 }
  0x26   : > { %p926_p4 = scmp.lt.s32.totalorder %s924_s11, %s917_s9 }
  0x27   : > { %p920_p0 = pnand %p918_p13, %p1313_p8 }
  0x28   : > { %p927_p1 = por %p926_p4, %p925_p5 }
  0x29   : > { %p921_p2 = pneg %p920_p0 }
  0x2b   : > { %p928_p3 = pnand %p927_p1, %p921_p2 }
  0x2d   : > { %931 = shalt.err (!%p928_p3)
}
  0x2e   : > { %808 = dma.hbm_to_vmem [thread:$0]  (!%p1297_p6), %s1641_s1, 16, %s256_s10, [#allocation6]  }
  0x2f   : > { %s932_s19 = scalar_lea.hbm %s1628_s3, 256 }
  0x30   : > { %p933_p7 = scmp.ne.s32.totalorder %s1628_s3, %s932_s19  ;;  %p939_p1 = scmp.lt.u32.totalorder %s932_s19, %s1628_s3 }
  0x32   : > { %p935_p9 = pnand %p933_p7, %p1313_p8 }
  0x34   : > { %p936_p4 = pneg %p935_p9 }
  0x36   : > { %p941_p3 = pnand %p939_p1, %p936_p4 }
  0x38   : > { %944 = shalt.err (!%p941_p3)
}
  0x39   : > { %s945_s10 = scalar_lea.vmem %s1301_s12, 256  ;;  %p953_p13 = scmp.lt.s32.totalorder %s1301_s12, %s1301_s12 }
  0x3a   : > { %p946_p10 = scmp.ne.s32.totalorder %s1301_s12, %s945_s10  ;;  %p954_p0 = scmp.lt.s32.totalorder %s945_s10, %s945_s10 }
  0x3c   : > { %p948_p11 = pnand %p946_p10, %p1313_p8  ;;  %p955_p2 = por %p954_p0, %p953_p13 }
  0x3e   : > { %p949_p12 = pneg %p948_p11 }
  0x40   : > { %p956_p5 = pnand %p955_p2, %p949_p12 }
  0x42   : > { %959 = shalt.err (!%p956_p5)
}
  0x43   : > { %s1201_s11 = smov 64   ;;  %s1202_s14 = smov 4  }
  0x44   : > { %814 = dma.hbm_to_vmem [thread:$0]  (!%p1297_p6), %s1628_s3, 256, %s1301_s12, [#allocation9], %s1201_s11, %s1201_s11, %s1202_s14  }
  0x45   : > { %s1643_s2 = sld [smem:[#allocation21_spill]] }
  0x4b   : > { %s960_s20 = scalar_lea.hbm %s1643_s2, 16 }
  0x4c   : > { %p961_p7 = scmp.ne.s32.totalorder %s1643_s2, %s960_s20  ;;  %p967_p1 = scmp.lt.u32.totalorder %s960_s20, %s1643_s2 }
  0x4e   : > { %p963_p9 = pnand %p961_p7, %p1313_p8 }
  0x50   : > { %p964_p4 = pneg %p963_p9 }
  0x52   : > { %p969_p3 = pnand %p967_p1, %p964_p4 }
  0x54   : > { %972 = shalt.err (!%p969_p3)
}
  0x55   : > { %s973_s16 = scalar_lea.vmem %s267_s15, 16  ;;  %s980_s12 = scalar_lea.vmem %s267_s15, 32 }
  0x56   : > { %p974_p10 = scmp.ne.s32.totalorder %s267_s15, %s973_s16  ;;  %p981_p13 = scmp.lt.s32.totalorder %s267_s15, %s267_s15 }
  0x57   : > { %p982_p0 = scmp.lt.s32.totalorder %s980_s12, %s973_s16 }
  0x58   : > { %p976_p11 = pnand %p974_p10, %p1313_p8 }
  0x59   : > { %p983_p2 = por %p982_p0, %p981_p13 }
  0x5a   : > { %p977_p12 = pneg %p976_p11 }
  0x5c   : > { %p984_p5 = pnand %p983_p2, %p977_p12 }
  0x5e   : > { %987 = shalt.err (!%p984_p5)
}
  0x5f   : > { %811 = dma.hbm_to_vmem [thread:$0]  (!%p1297_p6), %s1643_s2, 16, %s267_s15, [#allocation6]  }
  0x60   : > { %s1203_s17 = smov [#allocation10]   ;;  %s988_s22 = scalar_lea.hbm %s1629_s4, 16 }
  0x61   : > { %s290_s18 = sshll.u32 %s1203_s17, 4  ;;  %p989_p7 = scmp.ne.s32.totalorder %s1629_s4, %s988_s22  ;;  %s291_s18 = int_to_ptr.vmem [resolvable:$true] %s290_s18 }
  0x62   : > { %p995_p1 = scmp.lt.u32.totalorder %s988_s22, %s1629_s4 }
  0x63   : > { %p991_p9 = pnand %p989_p7, %p1313_p8 }
  0x65   : > { %p992_p4 = pneg %p991_p9 }
  0x67   : > { %p997_p3 = pnand %p995_p1, %p992_p4 }
  0x69   : > { %1000 = shalt.err (!%p997_p3)
}
  0x6a   : > { %s1001_s15 = scalar_lea.vmem %s291_s18, 16  ;;  %s1008_s12 = scalar_lea.vmem %s291_s18, 32 }
  0x6b   : > { %p1002_p10 = scmp.ne.s32.totalorder %s291_s18, %s1001_s15  ;;  %p1009_p13 = scmp.lt.s32.totalorder %s291_s18, %s291_s18 }
  0x6c   : > { %p1010_p0 = scmp.lt.s32.totalorder %s1008_s12, %s1001_s15 }
  0x6d   : > { %p1004_p11 = pnand %p1002_p10, %p1313_p8 }
  0x6e   : > { %p1011_p2 = por %p1010_p0, %p1009_p13 }
  0x6f   : > { %p1005_p12 = pneg %p1004_p11 }
  0x71   : > { %p1012_p5 = pnand %p1011_p2, %p1005_p12 }
  0x73   : > { %1015 = shalt.err (!%p1012_p5)
}
  0x74   : > { %817 = dma.hbm_to_vmem [thread:$0]  (!%p1297_p6), %s1629_s4, 16, %s291_s18, [#allocation9]  }
  0x75   : > { %s1635_s21 = sadd.s32 4294967294, %s1196_s29   ;;  %s41_s17 = sadd.s32 1, %s1192_s28 }
  0x76   : > { %p43_p8 = scmp.ge.s32.totalorder %s41_s17, 2  ;;  %s50_s13 = sadd.s32 1, %s1184_s26 }
  0x77   : > { %p57_p7 = scmp.ne.s32.totalorder %s1184_s26, %s1180_s25  ;;  %p58_p9 = scmp.eq.s32.totalorder %s1196_s29, 0 }
  0x78   : > { %s1665_s17 = smov (%p43_p8, %s41_s17), 0  ;;  %p63_p1 = scmp.ne.s32.totalorder %s1180_s25, %s1176_s24 }
  0x79   : > { %p1397_p4 = por %p58_p9, %p57_p7  ;;  %s45_s18 = ssub.s32 %s1192_s28, %s1665_s17 }
  0x7a   : > { %p173_p6 = scmp.eq.s32.totalorder %s1283_s30, 1  ;;  %p48_p3 = scmp.eq.s32.totalorder %s45_s18, 0 }
  0x7b   : > { %p1645_p10 = scmp.eq.s32.totalorder %s1283_s30, 0  ;;  %p179_p13 = scmp.eq.s32.totalorder %s1635_s21, 1 }
  0x7c   : > { %p1412_p12 = por %p173_p6, %p57_p7  ;;  %p836_p2 = scmp.lt.s32.totalorder %s1196_s29, 2 }
  0x7d   : > { %p1408_p11 = por %p1645_p10, %p63_p1  ;;  %p1421_p0 = por %p179_p13, %p63_p1 }
  0x7e   : > { %s1647_s22 = scalar_select %p1412_p12, 1, 0 }
  0x7f   : > { %s1419_s23 = scalar_select %p48_p3, %s1184_s26, %s50_s13  }
  0x80   : > { %s1648_s9 = scalar_select %p1421_p0, 1, 0 }
  0x81   : > { %s301_s10 = sand.u32 1, %s1184_s26   ;;  %s744_s16 = sshll.u32 %s1192_s28, 7 }
  0x82   : > { %s743_s15 = sshll.u32 %s301_s10, 3  ;;  %s1431_s14 = scalar_lea.hbm %s1625_s0, %s744_s16 }
  0x83   : > { %s305_s18 = scalar_lea.vmem [#allocation2], %s743_s15  ;;  %p1435_p5 = pnand %p836_p2, %p1397_p4 }
  0x84   : > { %s313_s13 = sshll.u32 %s305_s18, 4  ;;  %s302_s1 = scalar_lea.sflag [#allocation3], %s301_s10  ;;  %s1439_s13 = int_to_ptr.vmem [resolvable:$true] %s313_s13 }
  0x85   : > { %s1016_s2 = scalar_lea.hbm %s1431_s14, 128  ;;  %p1018_p7 = pneg %p1435_p5 }
  0x86   : > { %p1017_p8 = scmp.ne.s32.totalorder %s1431_s14, %s1016_s2  ;;  %s1021_s19 = scalar_lea.hbm %s1625_s0, 256 }
  0x87   : > { %p1022_p4 = scmp.lt.u32.totalorder %s1431_s14, %s1625_s0  ;;  %p1023_p6 = scmp.lt.u32.totalorder %s1021_s19, %s1016_s2 }
  0x88   : > { %p1019_p9 = pnand %p1018_p7, %p1017_p8  ;;  %p1025_p10 = scmp.lt.u32.totalorder %s1016_s2, %s1431_s14 }
  0x89   : > { %p1024_p3 = por %p1023_p6, %p1022_p4 }
  0x8a   : > { %p1020_p1 = pneg %p1019_p9 }
  0x8b   : > { %p1026_p13 = por %p1025_p10, %p1024_p3 }
  0x8d   : > { %p1027_p2 = pnand %p1026_p13, %p1020_p1 }
  0x8f   : > { %1030 = shalt.err (!%p1027_p2)
}
  0x90   : > { %s1031_s10 = scalar_lea.vmem %s1439_s13, 128  ;;  %s1204_s18 = smov [#allocation2]  }
  0x91   : > { %p1032_p8 = scmp.ne.s32.totalorder %s1439_s13, %s1031_s10  ;;  %s1036_s16 = sshll.u32 %s1204_s18, 4  ;;  %s1037_s16 = int_to_ptr.vmem [resolvable:$false] %s1036_s16 }
  0x92   : > { %s1038_s15 = scalar_lea.vmem %s1037_s16, 256  ;;  %p1039_p12 = scmp.lt.s32.totalorder %s1439_s13, %s1037_s16 }
  0x93   : > { %p1034_p9 = pnand %p1032_p8, %p1018_p7  ;;  %p1040_p4 = scmp.lt.s32.totalorder %s1038_s15, %s1031_s10 }
  0x95   : > { %p1035_p0 = pneg %p1034_p9  ;;  %p1041_p6 = por %p1040_p4, %p1039_p12 }
  0x97   : > { %p1042_p3 = pnand %p1041_p6, %p1035_p0 }
  0x99   : > { %1045 = shalt.err (!%p1042_p3)
}
  0x9a   : > { %821 = dma.hbm_to_vmem [thread:$0]  (!%p1435_p5), %s1431_s14, 128, %s1439_s13, %s302_s1  }
  0x9b   : > { %p1650_p1 = scmp.ne.s32.totalorder %s1639_s8, 0 }
  0x9c   : > { %s1469_s2 = sand.u32 (!%p1650_p1), 1, %s1180_s25  }
  0x9d   : > { %322 = sbr.rel (%p1650_p1) target bundleno = 856 (0x358), region = 40  ;;  %s746_s19 = sshll.u32 (!%p1650_p1), %s1469_s2, 3 }
  0x9e   : > { %s325_s12 = scalar_lea.sflag (!%p1650_p1), [#allocation3], %s1469_s2  ;;  %s328_s11 = scalar_lea.vmem (!%p1650_p1), [#allocation2], %s746_s19 }
  0xa4   : > { %1155 = dma.done.wait (%p1408_p11), %s325_s12, 128  }
  0xa5   : > { %1157 = vsyncadd (%p1408_p11), %s325_s12, 4294967168  ;;  %p1651_p12 = scmp.eq.s32.totalorder %s1283_s30, 0 }
  0xa7   : > { %1159 = dma.done.wait (%p1651_p12), [#allocation6], 32   ;;  %p1652_p0 = pmov %p1651_p12 }
  0xa9   : > { %1161 = vsyncadd (%p1652_p0), [#allocation6], 4294967264  ;;  %p1653_p5 = pmov %p1652_p0 }
  0xaa   : > { %p1654_p7 = pmov %p1652_p0 }
  0xab   : > { %1163 = dma.done.wait (%p1653_p5), [#allocation9], 272  }
  0xac   : > { %1165 = vsyncadd (%p1654_p7), [#allocation9], 4294967024  ;;  %vm389_vm0 = vcmask 261120   ;;  %v386_v0 = vld [vmem:[%s328_s11] sm:$0xff]  ;;  %v900_v7 = vld [vmem:[#allocation8] sm:$0xff]   ;;  %v1205_v8 = vmov 0.0  }
  0xad   : > { %v390_v1 = vsel %vm389_vm0, %v386_v0, 0.0  ;;  %773 = vmatprep.subr.bf16.mxu0 %v1205_v8  ;;  %v901_v9 = vld [vmem:[#allocation8 + $0x8] sm:$0xff]   ;;  %vm1206_vm1 = vmmov 0   ;;  %v754_v14 = vld [vmem:[#allocation5] ss:$0 sm:$0xff]  ;;  %s1489_s1 = sshll.u32 %s1469_s2, 2 }
  0xae   : > { %391 = vadd.xlane.f32.xlu0 %v390_v1  ;;  %774 = vmatpush3.bf16.msra.mxu0 %v900_v7  ;;  %v755_v16 = vld [vmem:[#allocation7] ss:$0 sm:$0xff]  ;;  %v756_v20 = vld [vmem:[#allocation10] ss:$0 sm:$0xff]  ;;  %s1492_s8 = sshll.u32 %s1188_s27, 6  ;;  %s370_s21 = scalar_lea.vmem [#allocation11], %s1489_s1 }
  0xaf   : > { %777 = vmatprep.mubr.msk.bf16.mxu0 %vm1206_vm1, %v1205_v8  ;;  %775 = vmatprep.subr.bf16.mxu0 %v1205_v8  ;;  %s526_s20 = sshll.u32 %s370_s21, 4  ;;  %vm487_vm2 = vcmask 257024   ;;  %s1207_s14 = smov 96   ;;  %s1501_s20 = int_to_ptr.vmem [resolvable:$true] %s526_s20 }
  0xb0   : > { %s1499_s18 = scalar_lea.hbm %s1630_s5, %s1492_s8  ;;  %s502_s27 = scalar_lea.sflag [#allocation4], %s1469_s2 }
  0xb1   : > { %s1046_s16 = scalar_lea.vmem %s1501_s20, 64  ;;  %p1655_p10 = scmp.ne.s32.totalorder %s1647_s22, 0 }
  0xb2   : > { %776 = vmatpush3.bf16.msra.mxu0 %v901_v9  ;;  %p1047_p11 = scmp.ne.s32.totalorder %s1501_s20, %s1046_s16  ;;  %s1208_s15 = smov [#allocation11]  }
  0xb3   : > { %s1050_s19 = sshll.u32 %s1208_s15, 4  ;;  %s1051_s19 = int_to_ptr.vmem [resolvable:$false] %s1050_s19 }
  0xb4   : > { %p1048_p13 = pnand %p1047_p11, %p1655_p10  ;;  %s1052_s12 = scalar_lea.vmem %s1051_s19, 128 }
  0xb5   : > { %p1053_p8 = scmp.lt.s32.totalorder %s1501_s20, %s1051_s19  ;;  %p1054_p9 = scmp.lt.s32.totalorder %s1052_s12, %s1046_s16 }
  0xb6   : > { %p1049_p2 = pneg %p1048_p13 }
  0xb7   : > { %p1055_p4 = por %p1054_p9, %p1053_p8 }
  0xb9   : > { %p1056_p6 = pnand %p1055_p4, %p1049_p2 }
 0x13b   : > { %v392_v2 = vpop.xlane.xlu0 %391 }
 0x13c   : > { %v394_v3 = vmul.f32 0.03125, %v392_v2 }
 0x13e   : > { %v395_v4 = vsub.f32 %v386_v0, %v394_v3 }
 0x140   : > { %v396_v5 = vmul.f32 %v395_v4, %v395_v4 }
 0x142   : > { %v397_v6 = vsel %vm389_vm0, %v396_v5, 0.0 }
 0x143   : > { %398 = vadd.xlane.f32.xlu0 %v397_v6 }
 0x1d0   : > { %v399_v10 = vpop.xlane.xlu0 %398 }
 0x1d1   : > { %v400_v11 = vmul.f32 0.03125, %v399_v10 }
 0x1d3   : > { %v401_v12 = vadd.f32 1e-05, %v400_v11 }
 0x1d5   : > { %902 = vrsqrt.f32 %v401_v12 }
 0x1df   : > { %v903_v13 = vpop.eup %902 }
 0x1e0   : > { %v403_v15 = vmul.f32 %v903_v13, %v395_v4 }
 0x1e2   : > { %v410_v17 = vmul.f32 %v754_v14, %v403_v15 }
 0x1e4   : > { %v417_v18 = vadd.f32 %v755_v16, %v410_v17 }
 0x1e6   : > { %v418_v19 = vpack.c.bf16 %v417_v18, %v417_v18 }
 0x1e8   : > { %778 = vmatmul.mubr.msk.bf16.vlgmr.msra.gmra.mrb[0].mxu0 %vm389_vm0, %v418_v19 }
 0x2bb   : > { %v479_v21 = vpop.f32.mrb[0].mxu0 }
 0x2bc   : > { %v480_v22 = vadd.f32 %v756_v20, %v479_v21  ;;  %v779_v23 = vpop.f32.mrb[1].mxu0 }
 0x2bd   : > { %v482_v24 = vpop.f32.mrb[2].mxu0 }
 0x2be   : > { %v485_v25 = vmul.f32 0.35355338, %v480_v22  ;;  %v780_v26 = vpop.f32.mrb[3].mxu0  ;;  %v769_v27 = vpack.c.bf16 %v480_v22, %v480_v22 }
 0x2c0   : > { %v486_v28 = vpack.c.bf16 %v485_v25, %v485_v25  ;;  %493 = vrot.lane.b32.xlu1 %v769_v27, %s1207_s14 }
 0x2c2   : > { %488 = vst.msk [vmem:[%s370_s21] sm:$0xf] %vm487_vm2, %v486_v28 }
 0x2c3   : > { %1059 = shalt.err (!%p1056_p6)
}
 0x2c4   : > { %s1060_s2 = scalar_lea.hbm %s1499_s18, 64  ;;  %s1064_s14 = scalar_lea.hbm %s1630_s5, 128 }
 0x2c5   : > { %p1061_p3 = scmp.ne.s32.totalorder %s1499_s18, %s1060_s2  ;;  %p1065_p0 = scmp.lt.u32.totalorder %s1499_s18, %s1630_s5 }
 0x2c6   : > { %p1066_p5 = scmp.lt.u32.totalorder %s1064_s14, %s1060_s2  ;;  %p1068_p11 = scmp.lt.u32.totalorder %s1060_s2, %s1499_s18 }
 0x2c7   : > { %p1062_p1 = pnand %p1061_p3, %p1655_p10 }
 0x2c8   : > { %p1067_p7 = por %p1066_p5, %p1065_p0 }
 0x2c9   : > { %p1063_p12 = pneg %p1062_p1 }
 0x2ca   : > { %p1069_p13 = por %p1068_p11, %p1067_p7 }
 0x2cc   : > { %p1070_p2 = pnand %p1069_p13, %p1063_p12 }
 0x2ce   : > { %1073 = shalt.err (!%p1070_p2)
}
 0x2cf   : > { %799 = dma.vmem_to_hbm [thread:$0]  (%p1655_p10), %s1501_s20, 64, %s1499_s18, %s502_s27  }
 0x2d0   : > { %s1209_s16 = smov 64   ;;  %s506_s15 = sand.u32 1, %s1283_s30  }
 0x2d1   : > { %497 = vrot.lane.b32.xlu1 %v769_v27, %s1209_s16  ;;  %s377_s19 = scalar_lea.vmem [#allocation12], %s1489_s1  ;;  %s1532_s21 = scalar_lea.hbm %s1631_s6, %s1492_s8 }
 0x2d2   : > { %s540_s12 = sshll.u32 %s377_s19, 4  ;;  %s384_s14 = scalar_lea.vmem [#allocation14], %s1489_s1  ;;  %s1534_s12 = int_to_ptr.vmem [resolvable:$true] %s540_s12 }
 0x2d3   : > { %s1539_s13 = sshll.u32 %s384_s14, 4  ;;  %s1542_s30 = scalar_lea.sflag [#allocation13], %s506_s15  ;;  %s1573_s13 = int_to_ptr.vmem [resolvable:$true] %s1539_s13 }
 0x2d4   : > { %s1074_s20 = scalar_lea.vmem %s1534_s12, 64  ;;  %s1210_s18 = smov [#allocation12]  }
 0x2d5   : > { %p1075_p8 = scmp.ne.s32.totalorder %s1534_s12, %s1074_s20  ;;  %s1078_s27 = sshll.u32 %s1210_s18, 4  ;;  %s1079_s27 = int_to_ptr.vmem [resolvable:$false] %s1078_s27 }
 0x2d6   : > { %s1080_s10 = scalar_lea.vmem %s1079_s27, 128  ;;  %p1081_p6 = scmp.lt.s32.totalorder %s1534_s12, %s1079_s27 }
 0x2d7   : > { %p1076_p9 = pnand %p1075_p8, %p1655_p10  ;;  %p1082_p3 = scmp.lt.s32.totalorder %s1080_s10, %s1074_s20 }
 0x2d9   : > { %p1077_p4 = pneg %p1076_p9  ;;  %p1083_p1 = por %p1082_p3, %p1081_p6 }
 0x2db   : > { %p1084_p12 = pnand %p1083_p1, %p1077_p4 }
 0x332   : > { %v494_v29 = vpop.permute.xlu1 %493 }
 0x333   : > { %496 = vst.msk [vmem:[%s377_s19] sm:$0xf] %vm487_vm2, %v494_v29 }
 0x334   : > { %1087 = shalt.err (!%p1084_p12)
}
 0x335   : > { %s1088_s16 = scalar_lea.hbm %s1532_s21, 64  ;;  %s1092_s2 = scalar_lea.hbm %s1631_s6, 128 }
 0x336   : > { %p1089_p0 = scmp.ne.s32.totalorder %s1532_s21, %s1088_s16  ;;  %p1093_p11 = scmp.lt.u32.totalorder %s1532_s21, %s1631_s6 }
 0x337   : > { %p1094_p13 = scmp.lt.u32.totalorder %s1092_s2, %s1088_s16  ;;  %p1096_p8 = scmp.lt.u32.totalorder %s1088_s16, %s1532_s21 }
 0x338   : > { %p1090_p5 = pnand %p1089_p0, %p1655_p10 }
 0x339   : > { %p1095_p2 = por %p1094_p13, %p1093_p11 }
 0x33a   : > { %p1091_p7 = pneg %p1090_p5 }
 0x33b   : > { %p1097_p9 = por %p1096_p8, %p1095_p2 }
 0x33d   : > { %p1098_p4 = pnand %p1097_p9, %p1091_p7 }
 0x33f   : > { %1101 = shalt.err (!%p1098_p4)
}
 0x340   : > { %800 = dma.vmem_to_hbm [thread:$0]  (%p1655_p10), %s1534_s12, 64, %s1532_s21, %s1542_s30  }
 0x341   : > { %s1570_s10 = scalar_lea.hbm %s1632_s7, %s1492_s8  ;;  %s1102_s16 = scalar_lea.vmem %s1573_s13, 64 }
 0x342   : > { %p1103_p6 = scmp.ne.s32.totalorder %s1573_s13, %s1102_s16  ;;  %s1211_s12 = smov [#allocation14]  }
 0x343   : > { %v498_v30 = vpop.permute.xlu1 %497  ;;  %s1106_s21 = sshll.u32 %s1211_s12, 4  ;;  %s1107_s21 = int_to_ptr.vmem [resolvable:$false] %s1106_s21 }
 0x344   : > { %500 = vst.msk [vmem:[%s384_s14] sm:$0xf] %vm487_vm2, %v498_v30  ;;  %p1104_p3 = pnand %p1103_p6, %p1655_p10  ;;  %s1108_s15 = scalar_lea.vmem %s1107_s21, 128 }
 0x345   : > { %p1109_p12 = scmp.lt.s32.totalorder %s1573_s13, %s1107_s21  ;;  %p1110_p0 = scmp.lt.s32.totalorder %s1108_s15, %s1102_s16 }
 0x346   : > { %p1105_p1 = pneg %p1104_p3 }
 0x347   : > { %p1111_p5 = por %p1110_p0, %p1109_p12 }
 0x349   : > { %p1112_p7 = pnand %p1111_p5, %p1105_p1 }
 0x34b   : > { %1115 = shalt.err (!%p1112_p7)
}
 0x34c   : > { %s1116_s1 = scalar_lea.hbm %s1570_s10, 64  ;;  %s1120_s19 = scalar_lea.hbm %s1632_s7, 128 }
 0x34d   : > { %p1117_p11 = scmp.ne.s32.totalorder %s1570_s10, %s1116_s1  ;;  %p1121_p8 = scmp.lt.u32.totalorder %s1570_s10, %s1632_s7 }
 0x34e   : > { %p1122_p9 = scmp.lt.u32.totalorder %s1120_s19, %s1116_s1  ;;  %p1124_p6 = scmp.lt.u32.totalorder %s1116_s1, %s1570_s10 }
 0x34f   : > { %p1118_p13 = pnand %p1117_p11, %p1655_p10 }
 0x350   : > { %p1123_p4 = por %p1122_p9, %p1121_p8 }
 0x351   : > { %p1119_p2 = pneg %p1118_p13 }
 0x352   : > { %p1125_p3 = por %p1124_p6, %p1123_p4 }
 0x354   : > { %p1126_p1 = pnand %p1125_p3, %p1119_p2 }
 0x356   : > { %1129 = shalt.err (!%p1126_p1)
}
 0x357   : > { %801 = dma.vmem_to_hbm [thread:$0]  (%p1655_p10), %s1573_s13, 64, %s1570_s10, %s1542_s30  }
 0x358 PF: > { %s566_s18 = sand.u32 1, %s1176_s24   ;;  %p1656_p12 = scmp.ne.s32.totalorder %s1648_s9, 0 }
 0x359   : > { %p1657_p0 = scmp.ge.s32.totalorder %s1196_s29, 2  ;;  %s567_s20 = scalar_lea.sflag [#allocation4], %s566_s18 }
 0x35b   : > { %p823_p5 = pnand %p1657_p0, %p1656_p12 }
 0x35d   : > { %1167 = dma.done.wait (!%p823_p5), %s567_s20, 64  }
 0x35e   : > { %1169 = vsyncadd (!%p823_p5), %s567_s20, 4294967232  ;;  %s1658_s27 = sadd.s32 4294967294, %s1196_s29  }
 0x35f   : > { %s575_s16 = sand.u32 1, %s1658_s27  }
 0x360   : > { %s576_s12 = scalar_lea.sflag [#allocation13], %s575_s16 }
 0x361   : > { %1171 = dma.done.wait (!%p823_p5), %s576_s12, 128  }
 0x362   : > { %1173 = vsyncadd (!%p823_p5), %s576_s12, 4294967168  ;;  %s29_s29 = sadd.s32 1, %s1196_s29   ;;  %s1659_s24 = smov %s1180_s25 }
 0x363   : > { %p26_p10 = scmp.ge.s32.totalorder %s29_s29, 4   ;;  %s1660_s25 = smov %s1184_s26 }
 0x364   : > { %s1661_s26 = smov %s1419_s23  ;;  %s1662_s27 = smov %s1192_s28 }
 0x365   : > { %s1663_s28 = smov %s1665_s17  ;;  %28 = sbr.rel (!%p26_p10) target bundleno = 13 (0xd), region = 133 }
 0x36c   :  { %590 = vsyncpa [#allocation3], 1 }
 0x36d   :  { %592 = vsyncpa [#allocation3 + $0x1], 1 }
 0x36e   :  { %593 = vsyncpa [#allocation6], 1 }
 0x36f   :  { %594 = vsyncpa [#allocation9], 1 }
 0x370   :  { %595 = vsyncpa [#allocation4], 1 }
 0x371   :  { %597 = vsyncpa [#allocation4 + $0x1], 1 }
 0x372   :  { %598 = vsyncpa [#allocation13], 1 }
 0x373   :  { %600 = vsyncpa [#allocation13 + $0x1], 1 }

</bundles_post_ra>
